<compile_context>
chip_gen: v5e
topology: v5e:2x2
jax: 0.10.0
libtpu: 0.0.40
codegen_flags: <defaults>
</compile_context>

<pallas_src>
import numpy as np
import jax
import jax.numpy as jnp
from jax.experimental import pallas as pl
from jax.experimental.pallas import tpu as pltpu


def _conv_block_kernel(d_ref, w_ref, b_ref, o_ref):
    """One (batch, row-tile) step: conv3x3 (one MXU matmul) + bias + ReLU + 2x2 max-pool.

    d_ref: (1, TH, Wh, 12*Cin)  bf16; D[r, j, (ky*4+d)*Cin+ci] = xpad[r+ky, 2j+d, ci]
    w_ref: (12*Cin, 2*CP)       bf16; lanes [0:CP) -> even output cols, [CP:2CP) -> odd
    b_ref: (1, 2*CP)            f32 fused conv+BN bias (duplicated per lane half)
    o_ref: (1, TH//2, Wh, CP)   bf16 pooled output tile (lane-dense, unmasked store)
    """
    th_half, wh, cp = o_ref.shape[1], o_ref.shape[2], o_ref.shape[3]
    th = 2 * th_half
    kdim = w_ref.shape[0]                               # 12*Cin

    # --- conv3x3: a single MXU matmul (ky and kx/column-parity folded into K/N) ---
    lhs = d_ref[0].reshape(th * wh, kdim)               # leading-dim merge (layout no-op)
    acc = jnp.dot(lhs, w_ref[...], preferred_element_type=jnp.float32)

    # --- fused conv+BN bias + ReLU (BN scale already folded into the weights) ---
    y = jnp.maximum(acc + b_ref[...], 0.0)              # (TH*Wh, 2*CP)

    # Dropout(p): identity in eval mode.
    # TODO(synk): training-mode Dropout (pltpu.prng_random_bits mask) and
    # BatchNorm batch statistics are not implemented; this kernel is eval-only.

    # --- 2x2 max-pool on the VPU: even/odd output columns sit in the two lane
    # halves; even/odd rows are a pure leading-dim split.  No lane shuffles. ---
    col_max = jnp.maximum(y[:, :cp], y[:, cp:])
    col_max = col_max.reshape(th_half, 2, wh, cp)
    pooled = jnp.maximum(col_max[:, 0], col_max[:, 1])
    o_ref[0] = pooled.astype(o_ref.dtype)               # (TH//2, Wh, CP) bf16


def _pick_row_tile(n, h, wh, cin, max_m=1024, vmem_budget=4 << 20):
    """Largest even divisor of h keeping the matmul M-dim (th*wh) and the
    per-step input tile modest, while preserving >= 2 independent grid steps
    so both v7x TensorCores get work."""
    divs = sorted((d for d in range(2, h + 1, 2) if h % d == 0), reverse=True)

    def ok(th):
        return th * wh <= max_m and th * wh * 12 * cin * 2 <= vmem_budget

    th = next((d for d in divs if ok(d)), divs[-1])
    while n * (h // th) < 2:
        smaller = [d for d in divs if d < th]
        if not smaller:
            break
        th = smaller[0]
    return th


def my_conv_block(x_nchw, params, dropout_p=0.0, eps=1e-5):
    """Pallas-backed equivalent of MyConvBlock.forward (eval mode). Run under jit."""
    del dropout_p  # eval-mode Dropout is the identity
    conv_w = params["conv_w"]      # (Cout, Cin, 3, 3) -- PyTorch layout
    conv_b = params["conv_b"]      # (Cout,)
    gamma, beta = params["bn_w"], params["bn_b"]
    rmean, rvar = params["bn_rm"], params["bn_rv"]

    n, cin, h, w = x_nchw.shape
    cout = conv_w.shape[0]
    assert h % 2 == 0 and w % 2 == 0, "MaxPool2d(2,2) path assumes even H, W"
    hh, wh = h // 2, w // 2
    cp = ((cout + 127) // 128) * 128               # pad Cout to lane-dense 128
    th = _pick_row_tile(n, h, wh, cin)             # conv rows per grid step (even, divides h)
    f32, bf16 = jnp.float32, jnp.bfloat16

    # ---------------- glue (plain JAX, fused under jit): layout / param prep ----------------
    # NHWC + spatial padding=1.
    xhwc = jnp.transpose(x_nchw, (0, 2, 3, 1)).astype(f32)
    xp = jnp.pad(xhwc, ((0, 0), (1, 1), (1, 1), (0, 0)))           # (N, H+2, W+2, Cin)
    # Pack the 3 ky taps and the 4 column-pair positions onto channels (bf16):
    #   D[n, r, j, (ky*4+d)*Cin+ci] = xp[n, r+ky, 2j+d, ci]
    taps = [xp[:, ky:ky + h, d:d + w:2, :] for ky in range(3) for d in range(4)]
    d_in = jnp.stack(taps, axis=3).reshape(n, h, wh, 12 * cin).astype(bf16)

    # Fold BN (eval) into the conv weights / bias, pad Cout -> CP, and pack the
    # even/odd output-column weights into the two lane halves of the N axis.
    scale = gamma / jnp.sqrt(rvar + eps)
    bias = (conv_b - rmean) * scale + beta
    w_s = conv_w.astype(f32) * scale[:, None, None, None]          # (Cout, Cin, 3, 3)
    w_t = jnp.transpose(w_s, (2, 3, 1, 0))                         # (ky, kx, Cin, Cout)
    w_t = jnp.pad(w_t, ((0, 0), (0, 0), (0, 0), (0, cp - cout)))   # (3, 3, Cin, CP)
    zpad = jnp.zeros((3, 1, cin, cp), f32)
    w_even = jnp.concatenate([w_t, zpad], axis=1)   # even cols: kx = d     (d=3 unused)
    w_odd = jnp.concatenate([zpad, w_t], axis=1)    # odd  cols: kx = d - 1 (d=0 unused)
    w_pack = jnp.concatenate([w_even, w_odd], axis=-1)             # (3, 4, Cin, 2*CP)
    w_pack = w_pack.reshape(12 * cin, 2 * cp).astype(bf16)

    bias_p = jnp.pad(bias.astype(f32), (0, cp - cout))
    bias_pack = jnp.concatenate([bias_p, bias_p]).reshape(1, 2 * cp)

    # ---------------- Pallas call ----------------
    grid = (n, h // th)
    out_full = pl.pallas_call(
        _conv_block_kernel,
        out_shape=jax.ShapeDtypeStruct((n, hh, wh, cp), bf16),
        grid_spec=pltpu.PrefetchScalarGridSpec(
            num_scalar_prefetch=0,
            grid=grid,
            in_specs=[
                # packed image: one row-tile per grid step (no full-image residency)
                pl.BlockSpec((1, th, wh, 12 * cin), lambda b, i: (b, i, 0, 0)),
                # weights / fused bias: small, constant index across the grid
                pl.BlockSpec((12 * cin, 2 * cp), lambda b, i: (0, 0)),
                pl.BlockSpec((1, 2 * cp), lambda b, i: (0, 0)),
            ],
            out_specs=pl.BlockSpec((1, th // 2, wh, cp),
                                   lambda b, i: (b, i, 0, 0)),
        ),
        compiler_params=pltpu.CompilerParams(
            dimension_semantics=("parallel", "parallel")),
    )(d_in, w_pack, bias_pack)

    out = out_full[..., :cout].astype(f32)           # drop CP padding lanes (fuses under jit)
    return jnp.transpose(out, (0, 3, 1, 2))           # back to NCHW


def _reference(x_nchw, params, eps=1e-5):
    """Pure-JAX f32 reference of the same eval-mode forward pass."""
    w_hwio = jnp.transpose(params["conv_w"], (2, 3, 1, 0)).astype(jnp.float32)
    x = jnp.transpose(x_nchw, (0, 2, 3, 1)).astype(jnp.float32)
    y = jax.lax.conv_general_dilated(
        x, w_hwio, window_strides=(1, 1), padding="SAME",
        dimension_numbers=("NHWC", "HWIO", "NHWC"))
    y = y + params["conv_b"]
    y = (y - params["bn_rm"]) / jnp.sqrt(params["bn_rv"] + eps)
    y = y * params["bn_w"] + params["bn_b"]
    y = jnp.maximum(y, 0.0)
    y = jax.lax.reduce_window(y, -jnp.inf, jax.lax.max,
                              (1, 2, 2, 1), (1, 2, 2, 1), "VALID")
    return jnp.transpose(y, (0, 3, 1, 2))


if __name__ == "__main__":
    key = jax.random.PRNGKey(0)
    k_x, k_w, k_b, k_g, k_be, k_rm, k_rv = jax.random.split(key, 7)

    N, IN_CH, OUT_CH, H, W = 2, 4, 8, 16, 16
    DROPOUT_P = 0.1  # eval mode => identity

    x = jax.random.normal(k_x, (N, IN_CH, H, W), jnp.float32)

    fan_in = IN_CH * 3 * 3
    bound = 1.0 / np.sqrt(fan_in)
    params = {
        "conv_w": jax.random.uniform(k_w, (OUT_CH, IN_CH, 3, 3), jnp.float32,
                                     -bound, bound),
        "conv_b": jax.random.uniform(k_b, (OUT_CH,), jnp.float32, -bound, bound),
        "bn_w": 1.0 + 0.1 * jax.random.normal(k_g, (OUT_CH,), jnp.float32),
        "bn_b": 0.1 * jax.random.normal(k_be, (OUT_CH,), jnp.float32),
        "bn_rm": 0.1 * jax.random.normal(k_rm, (OUT_CH,), jnp.float32),
        "bn_rv": 1.0 + 0.1 * jax.random.uniform(k_rv, (OUT_CH,), jnp.float32),
    }

    fwd = jax.jit(lambda xx, pp: my_conv_block(xx, pp, dropout_p=DROPOUT_P))
    out = jax.block_until_ready(fwd(x, params))
    assert out.shape == (N, OUT_CH, H // 2, W // 2), out.shape

    ref = _reference(x, params)
    # Tolerance accounts for bf16 matmul operands + bf16 output store vs the
    # pure-f32 reference (worst-case bf16 rounding here is ~1e-2 absolute).
    np.testing.assert_allclose(np.asarray(out), np.asarray(ref),
                               atol=5e-2, rtol=5e-2)
    print("KERNEL_OK")
</pallas_src>

<mosaic_0001>
module attributes {stable_mosaic.version = 11 : i64} {
  func.func @_conv_block_kernel(%arg0: i32, %arg1: i32, %arg2: memref<1x16x8x48xbf16, #tpu.memory_space<vmem>>, %arg3: memref<48x256xbf16, #tpu.memory_space<vmem>>, %arg4: memref<1x256xf32, #tpu.memory_space<vmem>>, %arg5: memref<1x8x8x128xbf16, #tpu.memory_space<vmem>>) attributes {dimension_semantics = [#tpu.dimension_semantics<parallel>, #tpu.dimension_semantics<parallel>], iteration_bounds = array<i64: 2, 1>, scalar_prefetch = 0 : i64, scratch_operands = 0 : i64, tpu.core_type = #tpu.core_type<tc>, window_params = [{transform_indices = @transform_0, window_bounds = array<i64: 1, 16, 8, 48>}, {pipeline_mode = #tpu.pipeline_mode<synchronous>, transform_indices = @transform_1, window_bounds = array<i64: 48, 256>}, {pipeline_mode = #tpu.pipeline_mode<synchronous>, transform_indices = @transform_2, window_bounds = array<i64: 1, 256>}, {transform_indices = @transform_3, window_bounds = array<i64: 1, 8, 8, 128>}]} {
    %c0 = arith.constant 0 : index
    %c0_0 = arith.constant 0 : index
    %c0_1 = arith.constant 0 : index
    %c0_2 = arith.constant 0 : index
    %0 = vector.load %arg2[%c0, %c0_0, %c0_1, %c0_2] : memref<1x16x8x48xbf16, #tpu.memory_space<vmem>>, vector<1x16x8x48xbf16>
    %1 = vector.shape_cast %0 : vector<1x16x8x48xbf16> to vector<16x8x48xbf16>
    %2 = vector.shape_cast %1 : vector<16x8x48xbf16> to vector<128x48xbf16>
    %c0_3 = arith.constant 0 : index
    %c0_4 = arith.constant 0 : index
    %3 = vector.load %arg3[%c0_3, %c0_4] : memref<48x256xbf16, #tpu.memory_space<vmem>>, vector<48x256xbf16>
    %cst = arith.constant dense<0.000000e+00> : vector<128x256xf32>
    %4 = tpu.matmul %2, %3, %cst {dimension_numbers = #tpu.dot_dimension_numbers<[1], [0], [0], [1], [0, 0, 1, 1], [], []>} : vector<128x48xbf16>, vector<48x256xbf16>, vector<128x256xf32> -> vector<128x256xf32>
    %c0_5 = arith.constant 0 : index
    %c0_6 = arith.constant 0 : index
    %5 = vector.load %arg4[%c0_5, %c0_6] : memref<1x256xf32, #tpu.memory_space<vmem>>, vector<1x256xf32>
    %6 = vector.broadcast %5 : vector<1x256xf32> to vector<128x256xf32>
    %7 = arith.addf %4, %6 : vector<128x256xf32>
    %cst_7 = arith.constant 0.000000e+00 : f32
    %8 = vector.broadcast %cst_7 : f32 to vector<128x256xf32>
    %9 = arith.maximumf %7, %8 : vector<128x256xf32>
    %10 = vector.extract_strided_slice %9 {offsets = [0, 0], sizes = [128, 128], strides = [1, 1]} : vector<128x256xf32> to vector<128x128xf32>
    %11 = vector.extract_strided_slice %9 {offsets = [0, 128], sizes = [128, 128], strides = [1, 1]} : vector<128x256xf32> to vector<128x128xf32>
    %12 = arith.maximumf %10, %11 : vector<128x128xf32>
    %13 = vector.shape_cast %12 : vector<128x128xf32> to vector<8x2x8x128xf32>
    %14 = vector.extract_strided_slice %13 {offsets = [0, 0, 0, 0], sizes = [8, 1, 8, 128], strides = [1, 1, 1, 1]} : vector<8x2x8x128xf32> to vector<8x1x8x128xf32>
    %15 = vector.shape_cast %14 : vector<8x1x8x128xf32> to vector<8x8x128xf32>
    %16 = vector.extract_strided_slice %13 {offsets = [0, 1, 0, 0], sizes = [8, 1, 8, 128], strides = [1, 1, 1, 1]} : vector<8x2x8x128xf32> to vector<8x1x8x128xf32>
    %17 = vector.shape_cast %16 : vector<8x1x8x128xf32> to vector<8x8x128xf32>
    %18 = arith.maximumf %15, %17 : vector<8x8x128xf32>
    %19 = arith.truncf %18 : vector<8x8x128xf32> to vector<8x8x128xbf16>
    %c0_8 = arith.constant 0 : index
    %c0_9 = arith.constant 0 : index
    %c0_10 = arith.constant 0 : index
    %c0_11 = arith.constant 0 : index
    %20 = vector.load %arg5[%c0_8, %c0_9, %c0_10, %c0_11] : memref<1x8x8x128xbf16, #tpu.memory_space<vmem>>, vector<1x8x8x128xbf16>
    %21 = vector.shape_cast %20 : vector<1x8x8x128xbf16> to vector<8x8x128xbf16>
    %22 = vector.shape_cast %19 : vector<8x8x128xbf16> to vector<1x8x8x128xbf16>
    tpu.vector_store %arg5[%c0_8, %c0_9, %c0_10, %c0_11], %22 {strides = array<i32>} : memref<1x8x8x128xbf16, #tpu.memory_space<vmem>>, vector<1x8x8x128xbf16>,
    return
  }
  func.func @transform_0(%arg0: i32, %arg1: i32) -> (i32, i32, i32, i32) {
    %c0_i32 = arith.constant 0 : i32
    %c0_i32_0 = arith.constant 0 : i32
    %c0_i32_1 = arith.constant 0 : i32
    return %arg0, %arg1, %c0_i32, %c0_i32_0 : i32, i32, i32, i32
  }
  func.func @transform_1(%arg0: i32, %arg1: i32) -> (i32, i32) {
    %c0_i32 = arith.constant 0 : i32
    %c0_i32_0 = arith.constant 0 : i32
    %c0_i32_1 = arith.constant 0 : i32
    return %c0_i32, %c0_i32_0 : i32, i32
  }
  func.func @transform_2(%arg0: i32, %arg1: i32) -> (i32, i32) {
    %c0_i32 = arith.constant 0 : i32
    %c0_i32_0 = arith.constant 0 : i32
    %c0_i32_1 = arith.constant 0 : i32
    return %c0_i32, %c0_i32_0 : i32, i32
  }
  func.func @transform_3(%arg0: i32, %arg1: i32) -> (i32, i32, i32, i32) {
    %c0_i32 = arith.constant 0 : i32
    %c0_i32_0 = arith.constant 0 : i32
    %c0_i32_1 = arith.constant 0 : i32
    return %arg0, %arg1, %c0_i32, %c0_i32_0 : i32, i32, i32, i32
  }
}

</mosaic_0001>

<bundles_post_ra>
// kernel: _lambda_.1
= control target key start
LH: loop header
LB: loop body
LE: loop exit
PB: predicated region body
PF: predicated region fallthrough
CT: control target
= control target key end

     0   :  { %s787_s12 = smov 0   ;;  %s789_s13 = smov 0   ;;  %s925_s0 = inlined_call_operand.vmem [shape: bf16[2,16,8,48], index: 0, kind: input, shape index: {}]   ;;  %s926_s1 = inlined_call_operand.vmem [shape: bf16[48,256], index: 1, kind: input, shape index: {}]   ;;  %s927_s2 = inlined_call_operand.vmem [shape: f32[1,256], index: 2, kind: input, shape index: {}]   ;;  %s928_s3 = inlined_call_operand.vmem [shape: bf16[2,8,8,128], index: 3, kind: output, shape index: {}]  }
   0x1   :  { %s791_s14 = smov 0  }
   0x2 LB: > { %s25_s15 = sadd.s32 1, %s761_s13  ;;  %p595_p0 = scmp.ge.s32.totalorder %s765_s14, 1  ;;  %s765_s14 = sphi %s791_s14, %s13_s14   ;;  %s761_s13 = sphi %s789_s13, %s930_s13   ;;  %s757_s12 = sphi %s787_s12, %s929_s12  }
   0x3   : > { %p27_p1 = scmp.ge.s32.totalorder %s25_s15, 2  ;;  %p158_p2 = scmp.lt.s32.totalorder %s765_s14, 3 }
   0x5   : > { %s932_s15 = smov (%p27_p1, %s25_s15), 0  ;;  %p159_p3 = pnand %p595_p0, %p158_p2 }
   0x6   : > { %p191_p4 = scmp.lt.s32.totalorder (!%p159_p3), %s757_s12, 1 }
   0x7   : > { %162 = sbr.rel (%p159_p3) target bundleno = 226 (0xe2), region = 32 }
   0xc   : > { %v650_v0 = vld [vmem:[%s926_s1 + $0x20] sm:$0xf]  ;;  %v689_v1 = vld [vmem:[%s926_s1 + $0x24] sm:$0xf0]  ;;  %v688_v2 = vld [vmem:[%s926_s1 + $0x24] sm:$0xf] }
   0xd   : > { %v651_v3 = vor.u32 %v689_v1, %v650_v0  ;;  %v652_v4 = vld [vmem:[%s926_s1 + $0x28] sm:$0xf0]  ;;  %v642_v5 = vld [vmem:[%s926_s1 + $0x10] sm:$0xf]  ;;  %v687_v6 = vld [vmem:[%s926_s1 + $0x14] sm:$0xf0] }
   0xe   : > { %v655_v7 = vor.u32 %v688_v2, %v652_v4  ;;  %v686_v8 = vld [vmem:[%s926_s1 + $0x14] sm:$0xf]  ;;  %v644_v9 = vld [vmem:[%s926_s1 + $0x18] sm:$0xf0]  ;;  %v643_v10 = vor.u32 %v687_v6, %v642_v5  ;;  %v634_v12 = vld [vmem:[%s926_s1] sm:$0xf] }
   0xf   : > { %339 = vmatpush.bf16.msra.mxu0 %v651_v3  ;;  %713 = vmatpush.bf16.msra.mxu2 %v651_v3  ;;  %v647_v11 = vor.u32 %v686_v8, %v644_v9  ;;  %v685_v13 = vld [vmem:[%s926_s1 + $0x4] sm:$0xf0]  ;;  %v684_v14 = vld [vmem:[%s926_s1 + $0x4] sm:$0xf]  ;;  %v636_v15 = vld [vmem:[%s926_s1 + $0x8] sm:$0xf0] }
  0x10   : > { %388 = vmatpush.bf16.msra.mxu1 %v655_v7  ;;  %716 = vmatpush.bf16.msra.mxu3 %v655_v7  ;;  %s934_s12 = smov (!%p191_p4, %s757_s12), 1  ;;  %v635_v16 = vor.u32 %v685_v13, %v634_v12  ;;  %v639_v17 = vor.u32 %v684_v14, %v636_v15  ;;  %vm309_vm0 = vcmask 392192   ;;  %v233_v32 = vld [vmem:[%s927_s2] sm:$0x3] }
  0x11   : > { %s674_s17 = sshll.u32 %s934_s12, 6  ;;  %v870_v36 = vperm.slane %v233_v32, 0  ;;  %v872_v37 = vperm.slane %v233_v32, 1  ;;  %s675_s23 = sshll.u32 %s934_s12, 5 }
  0x12   : > { %s198_s20 = scalar_lea.vmem %s925_s0, %s674_s17  ;;  %s894_s26 = scalar_lea.vmem %s928_s3, %s675_s23 }
  0x13   : > { %340 = vmatpush.bf16.msra.mxu0 %v643_v10  ;;  %714 = vmatpush.bf16.msra.mxu2 %v643_v10  ;;  %v676_v18 = vld [vmem:[%s198_s20] sm:$0xff]  ;;  %v677_v20 = vld [vmem:[%s198_s20 + $0x8] sm:$0xff]  ;;  %v678_v22 = vld [vmem:[%s198_s20 + $0x10] sm:$0xff] }
  0x14   : > { %389 = vmatpush.bf16.msra.mxu1 %v647_v11  ;;  %717 = vmatpush.bf16.msra.mxu3 %v647_v11  ;;  %v680_v19 = vld [vmem:[%s198_s20 + $0x20] sm:$0xff]  ;;  %v681_v21 = vld [vmem:[%s198_s20 + $0x28] sm:$0xff]  ;;  %v682_v23 = vld [vmem:[%s198_s20 + $0x30] sm:$0xff] }
  0x15   : > { %v679_v24 = vld [vmem:[%s198_s20 + $0x18] sm:$0xff] }
  0x16   : > { %v683_v25 = vld [vmem:[%s198_s20 + $0x38] sm:$0xff] }
  0x17   : > { %341 = vmatpush.bf16.msra.mxu0 %v635_v16  ;;  %715 = vmatpush.bf16.msra.mxu2 %v635_v16 }
  0x18   : > { %390 = vmatpush.bf16.msra.mxu1 %v639_v17  ;;  %718 = vmatpush.bf16.msra.mxu3 %v639_v17 }
  0x1a   : > { %656 = vmatmul.msk.bf16.vlgmr.msra.gmra.mxu0 %vm309_vm0, %v676_v18  ;;  %660 = vmatmul.msk.bf16.vlgmr.msra.gmra.mxu2 %vm309_vm0, %v680_v19 }
  0x1b   : > { %664 = vmatmul.msk.bf16.vlgmr.msra.gmra.mxu1 %vm309_vm0, %v676_v18  ;;  %668 = vmatmul.msk.bf16.vlgmr.msra.gmra.mxu3 %vm309_vm0, %v680_v19 }
  0x2a   : > { %657 = vmatmul.msk.bf16.gmra.mxu0 %vm309_vm0, %v677_v20  ;;  %661 = vmatmul.msk.bf16.gmra.mxu2 %vm309_vm0, %v681_v21 }
  0x2b   : > { %665 = vmatmul.msk.bf16.gmra.mxu1 %vm309_vm0, %v677_v20  ;;  %669 = vmatmul.msk.bf16.gmra.mxu3 %vm309_vm0, %v681_v21 }
  0x3a   : > { %658 = vmatmul.msk.bf16.gmra.mxu0 %vm309_vm0, %v678_v22  ;;  %662 = vmatmul.msk.bf16.gmra.mxu2 %vm309_vm0, %v682_v23 }
  0x3b   : > { %666 = vmatmul.msk.bf16.gmra.mxu1 %vm309_vm0, %v678_v22  ;;  %670 = vmatmul.msk.bf16.gmra.mxu3 %vm309_vm0, %v682_v23 }
  0x4a   : > { %659 = vmatmul.msk.bf16.gmra.mxu0 %vm309_vm0, %v679_v24  ;;  %663 = vmatmul.msk.bf16.gmra.mxu2 %vm309_vm0, %v683_v25 }
  0x4b   : > { %667 = vmatmul.msk.bf16.gmra.mxu1 %vm309_vm0, %v679_v24  ;;  %671 = vmatmul.msk.bf16.gmra.mxu3 %vm309_vm0, %v683_v25 }
  0x97   : > { %v343_v26 = vpop.f32.mrf.mxu0 }
  0x98   : > { %v392_v27 = vpop.f32.mrf.mxu1  ;;  %v344_v41 = vadd.f32 %v343_v26, %v870_v36 }
  0x99   : > { %v393_v42 = vadd.f32 %v392_v27, %v872_v37 }
  0x9a   : > { %v432_v50 = vmax.f32 %v344_v41, 0.0 }
  0x9b   : > { %v433_v51 = vmax.f32 %v393_v42, 0.0 }
  0x9d   : > { %v363_v28 = vpop.f32.mrf.mxu2  ;;  %v464_v2 = vmax.f32 %v432_v50, %v433_v51 }
  0x9e   : > { %v412_v29 = vpop.f32.mrf.mxu3  ;;  %v364_v59 = vadd.f32 %v363_v28, %v870_v36 }
  0x9f   : > { %v345_v30 = vpop.f32.mrf.mxu0  ;;  %v413_v60 = vadd.f32 %v412_v29, %v872_v37 }
  0xa0   : > { %v394_v31 = vpop.f32.mrf.mxu1  ;;  %v346_v39 = vadd.f32 %v345_v30, %v870_v36  ;;  %v448_v8 = vmax.f32 %v364_v59, 0.0 }
  0xa1   : > { %v395_v40 = vadd.f32 %v394_v31, %v872_v37  ;;  %v449_v9 = vmax.f32 %v413_v60, 0.0 }
  0xa2   : > { %v434_v46 = vmax.f32 %v346_v39, 0.0 }
  0xa3   : > { %v435_v47 = vmax.f32 %v395_v40, 0.0  ;;  %v472_v23 = vmax.f32 %v448_v8, %v449_v9 }
  0xa5   : > { %v365_v33 = vpop.f32.mrf.mxu2  ;;  %v465_v61 = vmax.f32 %v434_v46, %v435_v47 }
  0xa6   : > { %v414_v34 = vpop.f32.mrf.mxu3  ;;  %v366_v52 = vadd.f32 %v365_v33, %v870_v36 }
  0xa7   : > { %v348_v35 = vpop.f32.mrf.mxu0  ;;  %v415_v55 = vadd.f32 %v414_v34, %v872_v37  ;;  %v480_v10 = vmax.f32 %v464_v2, %v465_v61 }
  0xa8   : > { %v397_v38 = vpop.f32.mrf.mxu1  ;;  %v349_v43 = vadd.f32 %v348_v35, %v870_v36  ;;  %v450_v3 = vmax.f32 %v366_v52, 0.0 }
  0xa9   : > { %v398_v44 = vadd.f32 %v397_v38, %v872_v37  ;;  %v451_v4 = vmax.f32 %v415_v55, 0.0 }
  0xaa   : > { %v436_v56 = vmax.f32 %v349_v43, 0.0 }
  0xab   : > { %v437_v57 = vmax.f32 %v398_v44, 0.0  ;;  %v473_v20 = vmax.f32 %v450_v3, %v451_v4 }
  0xad   : > { %v368_v45 = vpop.f32.mrf.mxu2  ;;  %v466_v5 = vmax.f32 %v436_v56, %v437_v57  ;;  %v484_v26 = vmax.f32 %v472_v23, %v473_v20 }
  0xae   : > { %v417_v48 = vpop.f32.mrf.mxu3  ;;  %v369_v63 = vadd.f32 %v368_v45, %v870_v36 }
  0xaf   : > { %v350_v49 = vpop.f32.mrf.mxu0  ;;  %v418_v0 = vadd.f32 %v417_v48, %v872_v37 }
  0xb0   : > { %v351_v53 = vadd.f32 %v350_v49, %v870_v36  ;;  %v399_v54 = vpop.f32.mrf.mxu1  ;;  %v452_v13 = vmax.f32 %v369_v63, 0.0 }
  0xb1   : > { %v400_v58 = vadd.f32 %v399_v54, %v872_v37  ;;  %v453_v14 = vmax.f32 %v418_v0, 0.0 }
  0xb2   : > { %v438_v62 = vmax.f32 %v351_v53, 0.0 }
  0xb3   : > { %v439_v1 = vmax.f32 %v400_v58, 0.0  ;;  %v474_v24 = vmax.f32 %v452_v13, %v453_v14 }
  0xb5   : > { %v467_v6 = vmax.f32 %v438_v62, %v439_v1  ;;  %v370_v7 = vpop.f32.mrf.mxu2 }
  0xb6   : > { %v371_v11 = vadd.f32 %v370_v7, %v870_v36  ;;  %v419_v12 = vpop.f32.mrf.mxu3 }
  0xb7   : > { %v481_v15 = vmax.f32 %v466_v5, %v467_v6  ;;  %v420_v16 = vadd.f32 %v419_v12, %v872_v37  ;;  %v353_v17 = vpop.f32.mrf.mxu0 }
  0xb8   : > { %v454_v18 = vmax.f32 %v371_v11, 0.0  ;;  %v402_v19 = vpop.f32.mrf.mxu1  ;;  %v354_v41 = vadd.f32 %v353_v17, %v870_v36 }
  0xb9   : > { %v693_v21 = vpack.c.bf16 %v481_v15, %v480_v10  ;;  %v455_v22 = vmax.f32 %v420_v16, 0.0  ;;  %v403_v42 = vadd.f32 %v402_v19, %v872_v37 }
  0xba   : > { %v440_v50 = vmax.f32 %v354_v41, 0.0 }
  0xbb   : > { %694 = vst [vmem:[%s894_s26] sm:$0xff] %v693_v21   ;;  %v475_v25 = vmax.f32 %v454_v18, %v455_v22  ;;  %v441_v51 = vmax.f32 %v403_v42, 0.0 }
  0xbd   : > { %v485_v27 = vmax.f32 %v474_v24, %v475_v25  ;;  %v373_v28 = vpop.f32.mrf.mxu2  ;;  %v468_v2 = vmax.f32 %v440_v50, %v441_v51 }
  0xbe   : > { %v422_v29 = vpop.f32.mrf.mxu3  ;;  %v374_v59 = vadd.f32 %v373_v28, %v870_v36 }
  0xbf   : > { %v703_v30 = vpack.c.bf16 %v485_v27, %v484_v26  ;;  %v355_v31 = vpop.f32.mrf.mxu0  ;;  %v423_v60 = vadd.f32 %v422_v29, %v872_v37 }
  0xc0   : > { %v404_v32 = vpop.f32.mrf.mxu1  ;;  %v356_v39 = vadd.f32 %v355_v31, %v870_v36  ;;  %v456_v8 = vmax.f32 %v374_v59, 0.0 }
  0xc1   : > { %711 = vst [vmem:[%s894_s26 + $0x10] sm:$0xff] %v703_v30   ;;  %v405_v40 = vadd.f32 %v404_v32, %v872_v37  ;;  %v457_v9 = vmax.f32 %v423_v60, 0.0 }
  0xc2   : > { %v442_v46 = vmax.f32 %v356_v39, 0.0 }
  0xc3   : > { %v443_v47 = vmax.f32 %v405_v40, 0.0  ;;  %v476_v21 = vmax.f32 %v456_v8, %v457_v9 }
  0xc5   : > { %v375_v33 = vpop.f32.mrf.mxu2  ;;  %v469_v61 = vmax.f32 %v442_v46, %v443_v47 }
  0xc6   : > { %v424_v34 = vpop.f32.mrf.mxu3  ;;  %v376_v52 = vadd.f32 %v375_v33, %v870_v36 }
  0xc7   : > { %v358_v35 = vpop.f32.mrf.mxu0  ;;  %v425_v55 = vadd.f32 %v424_v34, %v872_v37  ;;  %v482_v10 = vmax.f32 %v468_v2, %v469_v61 }
  0xc8   : > { %v407_v38 = vpop.f32.mrf.mxu1  ;;  %v359_v43 = vadd.f32 %v358_v35, %v870_v36  ;;  %v458_v3 = vmax.f32 %v376_v52, 0.0 }
  0xc9   : > { %v408_v44 = vadd.f32 %v407_v38, %v872_v37  ;;  %v459_v4 = vmax.f32 %v425_v55, 0.0 }
  0xca   : > { %v444_v56 = vmax.f32 %v359_v43, 0.0 }
  0xcb   : > { %v445_v57 = vmax.f32 %v408_v44, 0.0  ;;  %v477_v18 = vmax.f32 %v458_v3, %v459_v4 }
  0xcd   : > { %v378_v45 = vpop.f32.mrf.mxu2  ;;  %v470_v5 = vmax.f32 %v444_v56, %v445_v57  ;;  %v486_v24 = vmax.f32 %v476_v21, %v477_v18 }
  0xce   : > { %v427_v48 = vpop.f32.mrf.mxu3  ;;  %v379_v63 = vadd.f32 %v378_v45, %v870_v36 }
  0xcf   : > { %v360_v49 = vpop.f32.mrf.mxu0  ;;  %v428_v0 = vadd.f32 %v427_v48, %v872_v37 }
  0xd0   : > { %v361_v53 = vadd.f32 %v360_v49, %v870_v36  ;;  %v409_v54 = vpop.f32.mrf.mxu1  ;;  %v460_v13 = vmax.f32 %v379_v63, 0.0 }
  0xd1   : > { %v410_v58 = vadd.f32 %v409_v54, %v872_v37  ;;  %v461_v14 = vmax.f32 %v428_v0, 0.0 }
  0xd2   : > { %v446_v62 = vmax.f32 %v361_v53, 0.0 }
  0xd3   : > { %v447_v1 = vmax.f32 %v410_v58, 0.0  ;;  %v478_v22 = vmax.f32 %v460_v13, %v461_v14 }
  0xd5   : > { %v471_v6 = vmax.f32 %v446_v62, %v447_v1  ;;  %v380_v7 = vpop.f32.mrf.mxu2 }
  0xd6   : > { %v381_v11 = vadd.f32 %v380_v7, %v870_v36  ;;  %v429_v12 = vpop.f32.mrf.mxu3 }
  0xd7   : > { %v483_v15 = vmax.f32 %v470_v5, %v471_v6  ;;  %v430_v16 = vadd.f32 %v429_v12, %v872_v37 }
  0xd8   : > { %v462_v17 = vmax.f32 %v381_v11, 0.0 }
  0xd9   : > { %v698_v19 = vpack.c.bf16 %v483_v15, %v482_v10  ;;  %v463_v20 = vmax.f32 %v430_v16, 0.0 }
  0xdb   : > { %710 = vst [vmem:[%s894_s26 + $0x8] sm:$0xff] %v698_v19   ;;  %v479_v23 = vmax.f32 %v462_v17, %v463_v20 }
  0xdd   : > { %v487_v25 = vmax.f32 %v478_v22, %v479_v23 }
  0xdf   : > { %v708_v26 = vpack.c.bf16 %v487_v25, %v486_v24 }
  0xe1   : > { %712 = vst [vmem:[%s894_s26 + $0x18] sm:$0xff] %v708_v26  }
  0xe2 PF: > { %s13_s14 = sadd.s32 1, %s765_s14   ;;  %s929_s12 = smov %s761_s13 }
  0xe3   : > { %p10_p5 = scmp.ge.s32.totalorder %s13_s14, 4   ;;  %s930_s13 = smov %s932_s15 }
  0xe5   :  { %12 = sbr.rel (!%p10_p5) target bundleno = 2 (0x2), region = 62 }

</bundles_post_ra>
